<compile_context>
chip_gen: v7x
topology: tpu7x:2x2x1
jax: 0.10.0
libtpu: 0.0.40
codegen_flags: <defaults>
</compile_context>

<pallas_src>
import jax
import jax.numpy as jnp
from jax.experimental import pallas as pl
from jax.experimental.pallas import tpu as pltpu

_LANE = 128


def _cdiv(a, b):
    return -(-a // b)


def _round_up(x, m):
    return _cdiv(x, m) * m


# ----------------------------------------------------------------------------- kernel

def _policy_kernel(x_ref, w1_ref, b1_ref, w2_ref, b2_ref, w3_ref, b3_ref,
                   scale_ref, bias_ref, o_ref):
    """Fused 3-layer MLP head. Output is written TRANSPOSED: (num_actions, tb)."""
    dot_dtype = w1_ref.dtype
    x = x_ref[...].astype(dot_dtype)                     # bf16 MXU operands, f32 acc

    # layer 1: Linear(num_inputs -> hidden) + ReLU      (bias/ReLU in f32 on the VPU)
    h1 = jnp.dot(x, w1_ref[...], preferred_element_type=jnp.float32)
    h1 = jnp.maximum(h1 + b1_ref[...], 0.0)

    # layer 2: Linear(hidden -> hidden) + ReLU
    h2 = jnp.dot(h1.astype(dot_dtype), w2_ref[...], preferred_element_type=jnp.float32)
    h2 = jnp.maximum(h2 + b2_ref[...], 0.0)

    # head, computed transposed so the store is lane-dense along the batch tile:
    #   m_t[a, b] = sum_h w3[a, h] * h2[b, h]   -> (num_actions, tb)
    m_t = jax.lax.dot_general(
        w3_ref[...], h2.astype(dot_dtype),
        dimension_numbers=(((1,), (1,)), ((), ())),
        preferred_element_type=jnp.float32)
    m_t = m_t + b3_ref[...]                              # (A, 1) broadcasts over lanes
    o_ref[...] = (jnp.tanh(m_t) * scale_ref[...] + bias_ref[...]).astype(o_ref.dtype)


# --------------------------------------------------------------------- tile selection

def _vmem_budget_and_cap():
    """(vmem_limit_bytes, max batch-tile rows), chosen per TPU generation."""
    vmem_cap = None
    try:
        info = pltpu.get_tpu_info()
        for name in ("vmem_capacity_bytes", "vmem_bytes", "vmem_size_bytes"):
            v = getattr(info, name, None)
            if v:
                vmem_cap = int(v)
                break
    except Exception:
        vmem_cap = None
    if vmem_cap is not None and vmem_cap >= 100 * 1024 * 1024:
        # v5e / v6e: 128 MiB physical VMEM -> raise the scoped limit, allow big tiles.
        return 64 * 1024 * 1024, 16384
    # v7x (64 MiB per TensorCore) or unknown hardware: stay conservative.
    return 40 * 1024 * 1024, 8192


def _choose_batch_tile(B, num_inputs, hidden_dim, num_actions,
                       state_itemsize, dot_itemsize, vmem_limit, tb_cap, block_b):
    if B <= _LANE:
        return B                                 # one full block (tb == full dim is legal)
    pad = lambda n: _round_up(n, _LANE)
    # Rough per-batch-row VMEM bytes: double-buffered state tile, its bf16 cast,
    # f32 + bf16 hidden activations, head temporaries, double-buffered (A, tb) output.
    per_row = (2 * pad(num_inputs) * state_itemsize
               + pad(num_inputs) * dot_itemsize
               + 2 * pad(hidden_dim) * (4 + dot_itemsize)
               + 2 * _round_up(num_actions, 8) * 4
               + 4 * num_actions)
    per_row += per_row // 2 + 256                # safety margin for compiler temporaries
    budget = max(vmem_limit - 4 * 1024 * 1024, 4 * 1024 * 1024)   # headroom for weights
    tb = min(budget // per_row, tb_cap)
    if block_b is not None:
        tb = min(tb, block_b)
    # Keep >= 2 grid steps so the "parallel" batch axis can occupy both v7x TensorCores.
    tb = min(tb, _round_up(_cdiv(B, 2), _LANE))
    tb = max((tb // _LANE) * _LANE, _LANE)       # lane-dense output tiles (multiple of 128)
    return tb


# -------------------------------------------------------------------------- wrapper

def deterministic_policy_forward(state, params, *, block_b=None):
    """state: (B, num_inputs). Returns mean actions (B, num_actions) in float32."""
    B, num_inputs = state.shape
    hidden_dim = params["w1"].shape[1]
    num_actions = params["w3"].shape[0]
    dot_itemsize = jnp.dtype(params["w1"].dtype).itemsize
    state_itemsize = jnp.dtype(state.dtype).itemsize

    vmem_limit, tb_cap = _vmem_budget_and_cap()
    tb = _choose_batch_tile(B, num_inputs, hidden_dim, num_actions,
                            state_itemsize, dot_itemsize, vmem_limit, tb_cap, block_b)
    n_tiles = _cdiv(B, tb)   # no jnp.pad: Pallas masks the partial last block itself

    def resident(arr):
        # Full-array block, same block index every grid step -> stays VMEM-resident.
        return pl.BlockSpec(arr.shape, lambda i: (0, 0))

    out_t = pl.pallas_call(
        _policy_kernel,
        out_shape=jax.ShapeDtypeStruct((num_actions, B), jnp.float32),
        grid=(n_tiles,),
        in_specs=[
            pl.BlockSpec((tb, num_inputs), lambda i: (i, 0)),   # batch tiles, pipelined
            resident(params["w1"]), resident(params["b1"]),
            resident(params["w2"]), resident(params["b2"]),
            resident(params["w3"]), resident(params["b3"]),
            resident(params["action_scale"]), resident(params["action_bias"]),
        ],
        out_specs=pl.BlockSpec((num_actions, tb), lambda i: (0, i)),  # lane-dense store
        compiler_params=pltpu.CompilerParams(
            dimension_semantics=("parallel",),   # batch tiles shard across v7x TCs
            vmem_limit_bytes=vmem_limit,
        ),
    )(state, params["w1"], params["b1"], params["w2"], params["b2"],
      params["w3"], params["b3"], params["action_scale"], params["action_bias"])

    # Module-facing layout (B, num_actions). Consumers that can accept the
    # (num_actions, B) layout should take `out_t` directly and skip this transpose.
    return out_t.T


# ---------------------------------------------------------------------- init / reference

def init_deterministic_policy_params(key, num_inputs, num_actions, hidden_dim,
                                     action_low=None, action_high=None,
                                     dot_dtype=jnp.bfloat16):
    k1, k2, k3 = jax.random.split(key, 3)

    def xavier(k, shape, fan_in, fan_out):
        # torch.nn.init.xavier_uniform_ gain=1: U(-a, a), a = sqrt(6/(fan_in+fan_out)).
        bound = float(jnp.sqrt(6.0 / (fan_in + fan_out)))
        return jax.random.uniform(k, shape, jnp.float32, minval=-bound, maxval=bound)

    if action_low is None or action_high is None:
        scale = jnp.ones((num_actions, 1), jnp.float32)
        bias = jnp.zeros((num_actions, 1), jnp.float32)
    else:
        scale = ((action_high - action_low) / 2.0).reshape(num_actions, 1).astype(jnp.float32)
        bias = ((action_high + action_low) / 2.0).reshape(num_actions, 1).astype(jnp.float32)
    return {
        # w1/w2 stored as (in, out) == W^T of the torch weight; w3 kept in torch
        # (num_actions, hidden) layout for the transposed (lane-dense) head matmul.
        "w1": xavier(k1, (num_inputs, hidden_dim), num_inputs, hidden_dim).astype(dot_dtype),
        "b1": jnp.zeros((1, hidden_dim), jnp.float32),
        "w2": xavier(k2, (hidden_dim, hidden_dim), hidden_dim, hidden_dim).astype(dot_dtype),
        "b2": jnp.zeros((1, hidden_dim), jnp.float32),
        "w3": xavier(k3, (num_actions, hidden_dim), hidden_dim, num_actions).astype(dot_dtype),
        "b3": jnp.zeros((num_actions, 1), jnp.float32),
        "action_scale": scale,
        "action_bias": bias,
    }


def _reference_forward(state, params):
    """Pure-JAX reference with the same dot dtype / f32 accumulation as the kernel."""
    dt = params["w1"].dtype
    h1 = jnp.maximum(
        jnp.dot(state.astype(dt), params["w1"], preferred_element_type=jnp.float32)
        + params["b1"], 0.0)
    h2 = jnp.maximum(
        jnp.dot(h1.astype(dt), params["w2"], preferred_element_type=jnp.float32)
        + params["b2"], 0.0)
    m = (jnp.dot(h2.astype(dt), params["w3"].T, preferred_element_type=jnp.float32)
         + params["b3"].T)
    return jnp.tanh(m) * params["action_scale"].T + params["action_bias"].T


# TODO(synk): DeterministicPolicy.sample() uses torch in-place Gaussian noise; it is not
# part of forward(), so it is left to host-side jax.random if needed.


if __name__ == "__main__":
    num_inputs, hidden_dim, num_actions = 16, 32, 4
    key = jax.random.PRNGKey(0)
    k_p32, k_pbf, k_s1, k_s2, k_s3 = jax.random.split(key, 5)

    # Test 1: f32 reference mode, tiny batch -> single full block, tight tolerance.
    params_f32 = init_deterministic_policy_params(
        k_p32, num_inputs, num_actions, hidden_dim, dot_dtype=jnp.float32)
    state1 = jax.random.normal(k_s1, (8, num_inputs), jnp.float32)
    out1 = jax.block_until_ready(deterministic_policy_forward(state1, params_f32))
    ref1 = _reference_forward(state1, params_f32)
    assert out1.shape == (8, num_actions), out1.shape
    assert jnp.allclose(out1, ref1, atol=1e-5, rtol=1e-5), "mismatch vs reference (f32, B=8)"

    # Test 2: bf16 MXU operands, multi-step grid with a partial last block
    # (B=300, tb=128 -> 3 steps), exercising the no-pad masked-store path.
    params_bf16 = init_deterministic_policy_params(
        k_pbf, num_inputs, num_actions, hidden_dim, dot_dtype=jnp.bfloat16)
    state2 = jax.random.normal(k_s2, (300, num_inputs), jnp.float32)
    out2 = jax.block_until_ready(
        deterministic_policy_forward(state2, params_bf16, block_b=128))
    ref2 = _reference_forward(state2, params_bf16)
    assert out2.shape == (300, num_actions), out2.shape
    assert jnp.allclose(out2, ref2, atol=2e-3, rtol=2e-3), "mismatch vs reference (bf16, B=300)"

    # Test 3: automatic tile sizing; B=1000 still splits into >=2 grid steps (v7x megacore).
    state3 = jax.random.normal(k_s3, (1000, num_inputs), jnp.float32)
    out3 = jax.block_until_ready(deterministic_policy_forward(state3, params_bf16))
    ref3 = _reference_forward(state3, params_bf16)
    assert out3.shape == (1000, num_actions), out3.shape
    assert jnp.allclose(out3, ref3, atol=2e-3, rtol=2e-3), "mismatch vs reference (bf16, B=1000)"

    print("KERNEL_OK")
</pallas_src>

<mosaic_0001>
module attributes {stable_mosaic.version = 11 : i64} {
  func.func @_policy_kernel(%arg0: i32, %arg1: memref<8x16xf32, #tpu.memory_space<vmem>>, %arg2: memref<16x32xf32, #tpu.memory_space<vmem>>, %arg3: memref<1x32xf32, #tpu.memory_space<vmem>>, %arg4: memref<32x32xf32, #tpu.memory_space<vmem>>, %arg5: memref<1x32xf32, #tpu.memory_space<vmem>>, %arg6: memref<4x32xf32, #tpu.memory_space<vmem>>, %arg7: memref<4x1xf32, #tpu.memory_space<vmem>>, %arg8: memref<4x1xf32, #tpu.memory_space<vmem>>, %arg9: memref<4x1xf32, #tpu.memory_space<vmem>>, %arg10: memref<4x8xf32, #tpu.memory_space<vmem>>) attributes {dimension_semantics = [#tpu.dimension_semantics<parallel>], iteration_bounds = array<i64: 1>, scalar_prefetch = 0 : i64, scratch_operands = 0 : i64, tpu.core_type = #tpu.core_type<tc>, window_params = [{transform_indices = @transform_0, window_bounds = array<i64: 8, 16>}, {pipeline_mode = #tpu.pipeline_mode<synchronous>, transform_indices = @transform_1, window_bounds = array<i64: 16, 32>}, {pipeline_mode = #tpu.pipeline_mode<synchronous>, transform_indices = @transform_2, window_bounds = array<i64: 1, 32>}, {pipeline_mode = #tpu.pipeline_mode<synchronous>, transform_indices = @transform_3, window_bounds = array<i64: 32, 32>}, {pipeline_mode = #tpu.pipeline_mode<synchronous>, transform_indices = @transform_4, window_bounds = array<i64: 1, 32>}, {pipeline_mode = #tpu.pipeline_mode<synchronous>, transform_indices = @transform_5, window_bounds = array<i64: 4, 32>}, {pipeline_mode = #tpu.pipeline_mode<synchronous>, transform_indices = @transform_6, window_bounds = array<i64: 4, 1>}, {pipeline_mode = #tpu.pipeline_mode<synchronous>, transform_indices = @transform_7, window_bounds = array<i64: 4, 1>}, {pipeline_mode = #tpu.pipeline_mode<synchronous>, transform_indices = @transform_8, window_bounds = array<i64: 4, 1>}, {transform_indices = @transform_9, window_bounds = array<i64: 4, 8>}]} {
    %c0 = arith.constant 0 : index
    %c0_0 = arith.constant 0 : index
    %0 = vector.load %arg1[%c0, %c0_0] : memref<8x16xf32, #tpu.memory_space<vmem>>, vector<8x16xf32>
    %c0_1 = arith.constant 0 : index
    %c0_2 = arith.constant 0 : index
    %1 = vector.load %arg2[%c0_1, %c0_2] : memref<16x32xf32, #tpu.memory_space<vmem>>, vector<16x32xf32>
    %cst = arith.constant dense<0.000000e+00> : vector<8x32xf32>
    %2 = tpu.matmul %0, %1, %cst {dimension_numbers = #tpu.dot_dimension_numbers<[1], [0], [0], [1], [0, 0, 1, 1], [], []>} : vector<8x16xf32>, vector<16x32xf32>, vector<8x32xf32> -> vector<8x32xf32>
    %c0_3 = arith.constant 0 : index
    %c0_4 = arith.constant 0 : index
    %3 = vector.load %arg3[%c0_3, %c0_4] : memref<1x32xf32, #tpu.memory_space<vmem>>, vector<1x32xf32>
    %4 = vector.broadcast %3 : vector<1x32xf32> to vector<8x32xf32>
    %5 = arith.addf %2, %4 : vector<8x32xf32>
    %cst_5 = arith.constant 0.000000e+00 : f32
    %6 = vector.broadcast %cst_5 : f32 to vector<8x32xf32>
    %7 = arith.maximumf %5, %6 : vector<8x32xf32>
    %c0_6 = arith.constant 0 : index
    %c0_7 = arith.constant 0 : index
    %8 = vector.load %arg4[%c0_6, %c0_7] : memref<32x32xf32, #tpu.memory_space<vmem>>, vector<32x32xf32>
    %cst_8 = arith.constant dense<0.000000e+00> : vector<8x32xf32>
    %9 = tpu.matmul %7, %8, %cst_8 {dimension_numbers = #tpu.dot_dimension_numbers<[1], [0], [0], [1], [0, 0, 1, 1], [], []>} : vector<8x32xf32>, vector<32x32xf32>, vector<8x32xf32> -> vector<8x32xf32>
    %c0_9 = arith.constant 0 : index
    %c0_10 = arith.constant 0 : index
    %10 = vector.load %arg5[%c0_9, %c0_10] : memref<1x32xf32, #tpu.memory_space<vmem>>, vector<1x32xf32>
    %11 = vector.broadcast %10 : vector<1x32xf32> to vector<8x32xf32>
    %12 = arith.addf %9, %11 : vector<8x32xf32>
    %cst_11 = arith.constant 0.000000e+00 : f32
    %13 = vector.broadcast %cst_11 : f32 to vector<8x32xf32>
    %14 = arith.maximumf %12, %13 : vector<8x32xf32>
    %c0_12 = arith.constant 0 : index
    %c0_13 = arith.constant 0 : index
    %15 = vector.load %arg6[%c0_12, %c0_13] : memref<4x32xf32, #tpu.memory_space<vmem>>, vector<4x32xf32>
    %cst_14 = arith.constant dense<0.000000e+00> : vector<4x8xf32>
    %16 = tpu.matmul %15, %14, %cst_14 {dimension_numbers = #tpu.dot_dimension_numbers<[1], [1], [0], [0], [0, 0, 1, 0], [], []>} : vector<4x32xf32>, vector<8x32xf32>, vector<4x8xf32> -> vector<4x8xf32>
    %c0_15 = arith.constant 0 : index
    %c0_16 = arith.constant 0 : index
    %17 = vector.load %arg7[%c0_15, %c0_16] : memref<4x1xf32, #tpu.memory_space<vmem>>, vector<4x1xf32>
    %18 = vector.broadcast %17 : vector<4x1xf32> to vector<4x8xf32>
    %19 = arith.addf %16, %18 : vector<4x8xf32>
    %20 = math.tanh %19 : vector<4x8xf32>
    %c0_17 = arith.constant 0 : index
    %c0_18 = arith.constant 0 : index
    %21 = vector.load %arg8[%c0_17, %c0_18] : memref<4x1xf32, #tpu.memory_space<vmem>>, vector<4x1xf32>
    %22 = vector.broadcast %21 : vector<4x1xf32> to vector<4x8xf32>
    %23 = arith.mulf %20, %22 : vector<4x8xf32>
    %c0_19 = arith.constant 0 : index
    %c0_20 = arith.constant 0 : index
    %24 = vector.load %arg9[%c0_19, %c0_20] : memref<4x1xf32, #tpu.memory_space<vmem>>, vector<4x1xf32>
    %25 = vector.broadcast %24 : vector<4x1xf32> to vector<4x8xf32>
    %26 = arith.addf %23, %25 : vector<4x8xf32>
    %c0_21 = arith.constant 0 : index
    %c0_22 = arith.constant 0 : index
    %27 = vector.load %arg10[%c0_21, %c0_22] : memref<4x8xf32, #tpu.memory_space<vmem>>, vector<4x8xf32>
    tpu.vector_store %arg10[%c0_21, %c0_22], %26 {strides = array<i32>} : memref<4x8xf32, #tpu.memory_space<vmem>>, vector<4x8xf32>,
    return
  }
  func.func @transform_0(%arg0: i32) -> (i32, i32) {
    %c0_i32 = arith.constant 0 : i32
    %c0_i32_0 = arith.constant 0 : i32
    return %arg0, %c0_i32 : i32, i32
  }
  func.func @transform_1(%arg0: i32) -> (i32, i32) {
    %c0_i32 = arith.constant 0 : i32
    %c0_i32_0 = arith.constant 0 : i32
    %c0_i32_1 = arith.constant 0 : i32
    return %c0_i32, %c0_i32_0 : i32, i32
  }
  func.func @transform_2(%arg0: i32) -> (i32, i32) {
    %c0_i32 = arith.constant 0 : i32
    %c0_i32_0 = arith.constant 0 : i32
    %c0_i32_1 = arith.constant 0 : i32
    return %c0_i32, %c0_i32_0 : i32, i32
  }
  func.func @transform_3(%arg0: i32) -> (i32, i32) {
    %c0_i32 = arith.constant 0 : i32
    %c0_i32_0 = arith.constant 0 : i32
    %c0_i32_1 = arith.constant 0 : i32
    return %c0_i32, %c0_i32_0 : i32, i32
  }
  func.func @transform_4(%arg0: i32) -> (i32, i32) {
    %c0_i32 = arith.constant 0 : i32
    %c0_i32_0 = arith.constant 0 : i32
    %c0_i32_1 = arith.constant 0 : i32
    return %c0_i32, %c0_i32_0 : i32, i32
  }
  func.func @transform_5(%arg0: i32) -> (i32, i32) {
    %c0_i32 = arith.constant 0 : i32
    %c0_i32_0 = arith.constant 0 : i32
    %c0_i32_1 = arith.constant 0 : i32
    return %c0_i32, %c0_i32_0 : i32, i32
  }
  func.func @transform_6(%arg0: i32) -> (i32, i32) {
    %c0_i32 = arith.constant 0 : i32
    %c0_i32_0 = arith.constant 0 : i32
    %c0_i32_1 = arith.constant 0 : i32
    return %c0_i32, %c0_i32_0 : i32, i32
  }
  func.func @transform_7(%arg0: i32) -> (i32, i32) {
    %c0_i32 = arith.constant 0 : i32
    %c0_i32_0 = arith.constant 0 : i32
    %c0_i32_1 = arith.constant 0 : i32
    return %c0_i32, %c0_i32_0 : i32, i32
  }
  func.func @transform_8(%arg0: i32) -> (i32, i32) {
    %c0_i32 = arith.constant 0 : i32
    %c0_i32_0 = arith.constant 0 : i32
    %c0_i32_1 = arith.constant 0 : i32
    return %c0_i32, %c0_i32_0 : i32, i32
  }
  func.func @transform_9(%arg0: i32) -> (i32, i32) {
    %c0_i32 = arith.constant 0 : i32
    %c0_i32_0 = arith.constant 0 : i32
    return %c0_i32, %arg0 : i32, i32
  }
}

</mosaic_0001>

<bundles_post_ra>
// kernel: tpu_custom_call.1
= control target key start
LH: loop header
LB: loop body
LE: loop exit
PB: predicated region body
PF: predicated region fallthrough
CT: control target
= control target key end

     0   :  { %14 = vsyncpa [#allocation3], 0  ;;  %s611_s0 = inlined_call_operand.hbm [shape: f32[8,16], index: 0, kind: input, shape index: {}]   ;;  %s612_s1 = inlined_call_operand.vmem [shape: f32[16,32], index: 1, kind: input, shape index: {}]   ;;  %s613_s2 = inlined_call_operand.vmem [shape: f32[1,32], index: 2, kind: input, shape index: {}]   ;;  %s614_s3 = inlined_call_operand.hbm [shape: f32[32,32], index: 3, kind: input, shape index: {}]   ;;  %s615_s4 = inlined_call_operand.vmem [shape: f32[1,32], index: 4, kind: input, shape index: {}]   ;;  %s616_s5 = inlined_call_operand.vmem [shape: f32[4,32], index: 5, kind: input, shape index: {}]   ;;  %s617_s6 = inlined_call_operand.vmem [shape: f32[4,1], index: 6, kind: input, shape index: {}]   ;;  %s618_s7 = inlined_call_operand.vmem [shape: f32[4,1], index: 7, kind: input, shape index: {}]   ;;  %s619_s8 = inlined_call_operand.vmem [shape: f32[4,1], index: 8, kind: input, shape index: {}]   ;;  %s620_s9 = inlined_call_operand.hbm [shape: f32[4,8], index: 9, kind: output, shape index: {}]  }
   0x1   :  { %15 = vsyncpa [#allocation6], 0 }
   0x2   :  { %16 = vsyncpa [#allocation4], 0  ;;  %s479_s30 = smov [#allocation2]   ;;  %s480_s11 = smov [#allocation5]  }
   0x3   :  { %s23_s10 = sshll.u32 %s479_s30, 4  ;;  %s36_s12 = sshll.u32 %s480_s11, 4  ;;  %s24_s10 = int_to_ptr.vmem [resolvable:$true] %s23_s10  ;;  %s538_s12 = int_to_ptr.vmem [resolvable:$true] %s36_s12 }
   0x4   :  { %s407_s15 = scalar_lea.hbm %s611_s0, 128 }
   0x5   :  { %p408_p0 = scmp.ne.s32.totalorder %s611_s0, %s407_s15  ;;  %p411_p1 = scmp.lt.u32.totalorder %s407_s15, %s611_s0 }
   0x7   :  { %p413_p2 = pnand %p411_p1, %p408_p0 }
   0x9   :  { %416 = shalt.err (!%p413_p2)
}
   0xa   :  { %s417_s20 = scalar_lea.vmem %s24_s10, 128  ;;  %p422_p4 = scmp.lt.s32.totalorder %s24_s10, %s24_s10 }
   0xb   :  { %p418_p3 = scmp.ne.s32.totalorder %s24_s10, %s417_s20  ;;  %p423_p5 = scmp.lt.s32.totalorder %s417_s20, %s417_s20 }
   0xd   :  { %p424_p6 = por %p423_p5, %p422_p4 }
   0xf   :  { %p425_p7 = pnand %p424_p6, %p418_p3 }
  0x11   :  { %428 = shalt.err (!%p425_p7)
}
  0x12   :  { %26 = dma.hbm_to_vmem [thread:$0]  %s611_s0, 128, %s24_s10, [#allocation3]  }
  0x13   :  { %s429_s25 = scalar_lea.hbm %s614_s3, 512 }
  0x14   :  { %p430_p8 = scmp.ne.s32.totalorder %s614_s3, %s429_s25  ;;  %p433_p9 = scmp.lt.u32.totalorder %s429_s25, %s614_s3 }
  0x16   :  { %p435_p10 = pnand %p433_p9, %p430_p8 }
  0x18   :  { %438 = shalt.err (!%p435_p10)
}
  0x19   :  { %s439_s30 = scalar_lea.vmem %s538_s12, 512  ;;  %p444_p12 = scmp.lt.s32.totalorder %s538_s12, %s538_s12 }
  0x1a   :  { %p440_p11 = scmp.ne.s32.totalorder %s538_s12, %s439_s30  ;;  %p445_p13 = scmp.lt.s32.totalorder %s439_s30, %s439_s30 }
  0x1c   :  { %p446_p0 = por %p445_p13, %p444_p12 }
  0x1e   :  { %p447_p1 = pnand %p446_p0, %p440_p11 }
  0x20   :  { %450 = shalt.err (!%p447_p1)
}
  0x21   :  { %s481_s0 = smov 128   ;;  %s482_s10 = smov 8  }
  0x22   :  { %42 = dma.hbm_to_vmem [thread:$0]  %s614_s3, 512, %s538_s12, [#allocation6], %s481_s0, %s481_s0, %s482_s10  }
  0x23   :  { %473 = dma.done.wait [#allocation3], 128  }
  0x24   :  { %474 = vsyncadd [#allocation3], 4294967168 }
  0x25   :  { %475 = dma.done.wait [#allocation6], 512  }
  0x26   :  { %476 = vsyncadd [#allocation6], 4294966784  ;;  %v483_v0 = vmov 0.0|0.0   ;;  %vm484_vm0 = vmmov 0   ;;  %v485_v1 = vmov 0.0   ;;  %v60_v2 = vld [vmem:[%s612_s1] sm:$0xff] }
  0x27   :  { %385 = vmatprep.subr.bf16.mxu0 %v483_v0  ;;  %366 = vmatprep.mubr.msk.f32.mxu0 %vm484_vm0, %v485_v1  ;;  %v61_v3 = vld [vmem:[%s612_s1 + $0x8] sm:$0xff]  ;;  %v145_v6 = vld [vmem:[#allocation5 + $0x8] sm:$0xff]  ;;  %v59_v8 = vld [vmem:[#allocation2] sm:$0xff]  ;;  %vm69_vm1 = vcmask 130048   ;;  %vm155_vm2 = vcmask 261120   ;;  %v486_v18 = vmov 0  }
  0x28   :  { %388 = vmatprep.subr.bf16.mxu1 %v483_v0  ;;  %377 = vmatprep.mubr.msk.f32.mxu1 %vm484_vm0, %v485_v1  ;;  %v386_v4 = vpack.c.bf16 %v61_v3, %v60_v2  ;;  %v144_v5 = vld [vmem:[#allocation5] sm:$0xff]  ;;  %v146_v9 = vld [vmem:[#allocation5 + $0x10] sm:$0xff]  ;;  %v147_v10 = vld [vmem:[#allocation5 + $0x18] sm:$0xff]  ;;  %vm328_vm3 = vcmask 60416  }
  0x29   :  { %v389_v7 = vpack.c.bf16 %v145_v6, %v144_v5  ;;  %v392_v11 = vpack.c.bf16 %v147_v10, %v146_v9  ;;  %v346_v12 = vld [vmem:[%s613_s2] ss:$0 sm:$0xff]  ;;  %403 = vset.pattern.permute.xlu0 %v486_v18  ;;  %404 = vset.pattern.permute.xlu1 %v486_v18 }
  0x2a   :  { %387 = vmatpush3.bf16.msra.mxu0 %v386_v4  ;;  %v231_v17 = vld [vmem:[%s617_s6] sm:$0xf] }
  0x2b   :  { %390 = vmatpush3.bf16.msra.mxu1 %v389_v7  ;;  %380 = vmatprep.subr.mxu0 %v485_v1  ;;  %v321_v19 = vld [vmem:[%s619_s8] sm:$0xf] }
  0x2c   :  { %391 = vmatprep.subr.bf16.mxu1 %v483_v0  ;;  %234 = vperm.xlu0 %403, %v231_v17   ;;  %v314_v20 = vld [vmem:[%s618_s7] sm:$0xf] }
  0x2d   :  { %367 = vmatmul.mubr.msk.f32.vlgmr.msra.gmra.mrb[0].mxu0 %vm69_vm1, %v59_v8  ;;  %324 = vperm.xlu1 %404, %v321_v19   ;;  %v348_v21 = vld [vmem:[%s615_s4] ss:$0 sm:$0xff]  ;;  %s487_s4 = smov [#allocation7]  }
  0x2e   :  { %382 = vmatprep.mubr.msk.f32.mxu0 %vm484_vm0, %v485_v1  ;;  %v230_v26 = vld [vmem:[%s616_s5] sm:$0xf]  ;;  %s336_s7 = sshll.u32 %s487_s4, 4  ;;  %s337_s7 = int_to_ptr.vmem [resolvable:$true] %s336_s7 }
  0x2f   :  { %393 = vmatpush3.bf16.msra.mxu1 %v392_v11  ;;  %s451_s8 = scalar_lea.vmem %s337_s7, 64  ;;  %p456_p3 = scmp.lt.s32.totalorder %s337_s7, %s337_s7 }
  0x30   :  { %317 = vperm.xlu0 %403, %v314_v20   ;;  %p452_p2 = scmp.ne.s32.totalorder %s337_s7, %s451_s8  ;;  %p457_p4 = scmp.lt.s32.totalorder %s451_s8, %s451_s8 }
  0x32   :  { %p458_p5 = por %p457_p4, %p456_p3 }
  0x34   :  { %p459_p6 = pnand %p458_p5, %p452_p2 }
  0xab   :  { %v235_v27 = vpop.permute.xlu0 %234 }
  0xac   :  { %v325_v33 = vpop.permute.xlu1 %324 }
  0xaf   :  { %v318_v32 = vpop.permute.xlu0 %317 }
 0x100   :  { %v139_v13 = vpop.f32.mrb[0].mxu0 }
 0x101   :  { %v140_v14 = vadd.f32 %v346_v12, %v139_v13  ;;  %v368_v15 = vpop.f32.mrb[1].mxu0 }
 0x103   :  { %v143_v16 = vmax.f32 %v140_v14, 0.0 }
 0x105   :  { %378 = vmatmul.mubr.msk.f32.vlgmr.msra.gmra.mrb[0].mxu1 %vm155_vm2, %v143_v16 }
 0x1d8   :  { %v225_v22 = vpop.f32.mrb[0].mxu1 }
 0x1d9   :  { %v226_v23 = vadd.f32 %v348_v21, %v225_v22  ;;  %v379_v24 = vpop.f32.mrb[1].mxu1 }
 0x1db   :  { %v229_v25 = vmax.f32 %v226_v23, 0.0 }
 0x1dd   :  { %381 = vmatpush3.xpose.msk.msra.mxu0 %vm155_vm2, %v229_v25 }
 0x1e0   :  { %383 = vmatmul.mubr.msk.f32.vlgmr.msra.gmra.mrb[2].mxu0 %vm155_vm2, %v230_v26 }
 0x2b3   :  { %v309_v28 = vpop.f32.mrb[2].mxu0 }
 0x2b4   :  { %v310_v29 = vadd.f32 %v309_v28, %v235_v27  ;;  %v384_v30 = vpop.f32.mrb[3].mxu0 }
 0x2b6   :  { %405 = vtanh.f32 %v310_v29 }
 0x2c0   :  { %v406_v31 = vpop.eup %405 }
 0x2c1   :  { %v320_v34 = vmul.f32 %v406_v31, %v318_v32 }
 0x2c3   :  { %v327_v35 = vadd.f32 %v325_v33, %v320_v34 }
 0x2c5   :  { %329 = vst.msk [vmem:[#allocation7] sm:$0xf] %vm328_vm3, %v327_v35 }
 0x2c6   :  { %462 = shalt.err (!%p459_p6)
}
 0x2c7   :  { %s463_s26 = scalar_lea.hbm %s620_s9, 64 }
 0x2c8   :  { %p464_p7 = scmp.ne.s32.totalorder %s620_s9, %s463_s26  ;;  %p467_p8 = scmp.lt.u32.totalorder %s463_s26, %s620_s9 }
 0x2ca   :  { %p469_p9 = pnand %p467_p8, %p464_p7 }
 0x2cc   :  { %472 = shalt.err (!%p469_p9)
}
 0x2cd   :  { %339 = dma.vmem_to_hbm [thread:$0]  %s337_s7, 64, %s620_s9, [#allocation4]  }
 0x2ce   :  { %477 = dma.done.wait [#allocation4], 64  }
 0x2cf   :  { %478 = vsyncadd [#allocation4], 4294967232 }
 0x2d0   :  { %343 = vsyncpa [#allocation3], 1 }
 0x2d1   :  { %344 = vsyncpa [#allocation6], 1 }
 0x2d2   :  { %345 = vsyncpa [#allocation4], 1 }

</bundles_post_ra>
